<compile_context>
chip_gen: v7x
topology: tpu7x:2x2x1
jax: 0.10.0
libtpu: 0.0.40
codegen_flags: <defaults>
</compile_context>

<pallas_src>
import functools

import jax
import jax.numpy as jnp
from jax.experimental import pallas as pl
from jax.experimental.pallas import tpu as pltpu

BN_EPS = 1e-5


def _round_up(x, m):
    return (x + m - 1) // m * m


# --------------------------------------------------------------------------- #
# Pass 1: conv (im2col matmul, K-tiled) + per-M-tile BN partial statistics.    #
# --------------------------------------------------------------------------- #
def _conv_stats_kernel(patches_ref, w_ref, y_ref, psum_ref, psumsq_ref, acc_ref):
    k = pl.program_id(1)

    @pl.when(k == 0)
    def _():
        acc_ref[...] = jnp.zeros_like(acc_ref)

    acc_ref[...] += jnp.dot(patches_ref[...], w_ref[...],
                            preferred_element_type=jnp.float32)

    @pl.when(k == pl.num_programs(1) - 1)
    def _():
        y = acc_ref[...]
        y_ref[...] = y.astype(y_ref.dtype)  # store conv output once (bf16) for pass 2
        psum_ref[...] = jnp.sum(y, axis=0, keepdims=True).reshape(1, 1, -1)
        psumsq_ref[...] = jnp.sum(y * y, axis=0, keepdims=True).reshape(1, 1, -1)


# --------------------------------------------------------------------------- #
# Pass 2: pure elementwise BN scale/shift + ReLU over the stored conv output.  #
# --------------------------------------------------------------------------- #
def _bn_relu_kernel(y_ref, scale_ref, shift_ref, o_ref):
    y = y_ref[...].astype(jnp.float32)
    o_ref[...] = jnp.maximum(y * scale_ref[...] + shift_ref[...], 0.0).astype(o_ref.dtype)


def _im2col(x, kh, kw, stride, padding):
    """x: (N, C, H, W) -> patches (N*OH*OW, C*KH*KW) (same dtype as x), plus (OH, OW)."""
    n, c, h, w = x.shape
    xp = jnp.pad(x, ((0, 0), (0, 0), (padding, padding), (padding, padding)))
    oh = (h + 2 * padding - kh) // stride + 1
    ow = (w + 2 * padding - kw) // stride + 1
    slabs = []
    for i in range(kh):
        for j in range(kw):
            slabs.append(xp[:, :, i:i + stride * oh:stride, j:j + stride * ow:stride])
    p = jnp.stack(slabs, axis=0).reshape(kh, kw, n, c, oh, ow)
    # -> (N, OH, OW, C, KH, KW): column order matches PyTorch weight layout (OC, C, KH, KW).
    p = p.transpose(2, 4, 5, 3, 0, 1).reshape(n * oh * ow, c * kh * kw)
    return p, oh, ow


def _pick_tile_k(kp, tk_req):
    """Largest multiple of 128 that divides kp and is <= max(tk_req, 128)."""
    q = kp // 128
    best = 128
    for d in range(1, q + 1):
        if q % d == 0 and 128 * d <= max(tk_req, 128):
            best = 128 * d
    return best


def _vmem_footprint(tile_m, tile_k, ocp):
    """Conservative per-step VMEM bytes for pass 1 (everything double-buffered)."""
    return (2 * tile_m * tile_k * 2     # patches tile (bf16)
            + 2 * tile_k * ocp * 2      # weight tile (bf16)
            + tile_m * ocp * 4          # f32 accumulator scratch
            + 2 * tile_m * ocp * 2      # y output tile (bf16)
            + 4 * ocp * 4)              # partial-stat output tiles


@functools.partial(jax.jit,
                   static_argnames=("kernel_size", "stride", "padding", "tm", "tk"))
def conv_block_forward(x, weight, bias=None, gamma=None, beta=None, *,
                       kernel_size=4, stride=2, padding=1, tm=512, tk=2048):
    """x: (N, C, H, W) f32; weight: (OC, C, KH, KW); bias: (OC,) (cancelled exactly by
    training-mode BN mean subtraction); gamma/beta: BN affine params (default 1/0).
    Returns NCHW f32.  tm/tk are per-generation tuning knobs (sweep tm=1024 on v6e/v5e)."""
    del bias  # cancels exactly under BN training-mode statistics (any gamma/beta)
    n, c, h, w = x.shape
    oc = weight.shape[0]
    kh = kw = kernel_size

    x = x.astype(jnp.bfloat16)  # build im2col in bf16: halves its HBM traffic
    patches, oh, ow = _im2col(x, kh, kw, stride, padding)      # (M, K) bf16
    m, k = patches.shape

    kp = _round_up(k, 128)
    ocp = _round_up(oc, 128)
    tile_m = max(16, min(_round_up(tm, 16), _round_up(m, 16)))  # bf16 sublane multiple
    tile_k = _pick_tile_k(kp, tk)

    budget = 48 * 1024 * 1024   # leaves headroom inside v7x's 64 MiB physical VMEM
    while _vmem_footprint(tile_m, tile_k, ocp) > budget and tile_m > 16:
        tile_m = max(16, _round_up(tile_m // 2, 16))
    mp = _round_up(m, tile_m)
    grid_m = mp // tile_m
    grid_k = kp // tile_k
    vmem_limit = int(min(max(2 * _vmem_footprint(tile_m, tile_k, ocp),
                             32 * 1024 * 1024), 56 * 1024 * 1024))

    # Skip the zero-pad copies when the static shapes are already tile/lane aligned.
    w_mat = weight.reshape(oc, k).T.astype(jnp.bfloat16)       # (K, OC)
    if (mp, kp) == (m, k):
        patches_p = patches
    else:
        patches_p = jnp.zeros((mp, kp), jnp.bfloat16).at[:m, :k].set(patches)
    if (kp, ocp) == (k, oc):
        w_p = w_mat
    else:
        w_p = jnp.zeros((kp, ocp), jnp.bfloat16).at[:k, :oc].set(w_mat)

    cparams = pltpu.CompilerParams(
        dimension_semantics=("parallel", "arbitrary"),
        vmem_limit_bytes=vmem_limit)

    # Pass 1: conv matmul + bf16 y store + per-tile partial BN stats (megacore-parallel M).
    y_p, psum, psumsq = pl.pallas_call(
        _conv_stats_kernel,
        out_shape=(jax.ShapeDtypeStruct((mp, ocp), jnp.bfloat16),
                   jax.ShapeDtypeStruct((grid_m, 1, ocp), jnp.float32),
                   jax.ShapeDtypeStruct((grid_m, 1, ocp), jnp.float32)),
        grid_spec=pltpu.PrefetchScalarGridSpec(
            num_scalar_prefetch=0,
            grid=(grid_m, grid_k),
            in_specs=[
                pl.BlockSpec((tile_m, tile_k), lambda i, j: (i, j)),
                pl.BlockSpec((tile_k, ocp), lambda i, j: (j, 0)),
            ],
            out_specs=(
                pl.BlockSpec((tile_m, ocp), lambda i, j: (i, 0)),
                pl.BlockSpec((1, 1, ocp), lambda i, j: (i, 0, 0)),
                pl.BlockSpec((1, 1, ocp), lambda i, j: (i, 0, 0)),
            ),
            scratch_shapes=[pltpu.VMEM((tile_m, ocp), jnp.float32)]),
        compiler_params=cparams,
    )(patches_p, w_p)

    # Tiny finalize in XLA (grid_m x OCp values): biased variance (clamped), affine fold.
    inv_m = 1.0 / float(m)
    ch_sum = jnp.sum(psum[:, 0, :], axis=0, keepdims=True)       # (1, OCp)
    ch_sumsq = jnp.sum(psumsq[:, 0, :], axis=0, keepdims=True)
    mean = ch_sum * inv_m
    var = jnp.maximum(ch_sumsq * inv_m - mean * mean, 0.0)       # guard f32 cancellation
    inv_std = jax.lax.rsqrt(var + BN_EPS)
    if gamma is None:
        gamma = jnp.ones((oc,), jnp.float32)
    if beta is None:
        beta = jnp.zeros((oc,), jnp.float32)
    if ocp == oc:
        gamma_p = gamma.astype(jnp.float32).reshape(1, ocp)
        beta_p = beta.astype(jnp.float32).reshape(1, ocp)
    else:
        gamma_p = jnp.zeros((1, ocp), jnp.float32).at[0, :oc].set(gamma.astype(jnp.float32))
        beta_p = jnp.zeros((1, ocp), jnp.float32).at[0, :oc].set(beta.astype(jnp.float32))
    scale = gamma_p * inv_std
    shift = beta_p - mean * scale

    # Pass 2: elementwise BN + ReLU over stored y, in place (no patch re-read / recompute).
    out = pl.pallas_call(
        _bn_relu_kernel,
        out_shape=jax.ShapeDtypeStruct((mp, ocp), jnp.bfloat16),
        grid_spec=pltpu.PrefetchScalarGridSpec(
            num_scalar_prefetch=0,
            grid=(grid_m,),
            in_specs=[
                pl.BlockSpec((tile_m, ocp), lambda i: (i, 0)),
                pl.BlockSpec((1, ocp), lambda i: (0, 0)),
                pl.BlockSpec((1, ocp), lambda i: (0, 0)),
            ],
            out_specs=pl.BlockSpec((tile_m, ocp), lambda i: (i, 0)),
        ),
        compiler_params=pltpu.CompilerParams(
            dimension_semantics=("parallel",),
            vmem_limit_bytes=vmem_limit),
        input_output_aliases={0: 0},
    )(y_p, scale, shift)

    # (M, OC) -> (N, OC, OH, OW): layout transpose runs on bf16 (half traffic), then f32.
    out = out[:m, :oc].reshape(n, oh, ow, oc).transpose(0, 3, 1, 2).astype(jnp.float32)
    return out


def _reference_forward(x, weight, bias, gamma, beta, *, stride=2, padding=1):
    """Pure-JAX f32 reference: Conv2d + BatchNorm2d(training stats, affine) + ReLU."""
    y = jax.lax.conv_general_dilated(
        x, weight, window_strides=(stride, stride),
        padding=((padding, padding), (padding, padding)),
        dimension_numbers=("NCHW", "OIHW", "NCHW"))
    y = y + bias[None, :, None, None]
    mean = jnp.mean(y, axis=(0, 2, 3), keepdims=True)
    var = jnp.mean(jnp.square(y - mean), axis=(0, 2, 3), keepdims=True)
    yn = (y - mean) * jax.lax.rsqrt(var + BN_EPS)
    return jnp.maximum(yn * gamma[None, :, None, None] + beta[None, :, None, None], 0.0)


if __name__ == "__main__":
    # ConvBlock(input_size=16, output_size=8, kernel_size=4, stride=2, padding=1,
    #           bias=True, activation='relu', norm='batch')
    N, C, H, W = 2, 16, 16, 16
    OC, KH, KW = 8, 4, 4

    key = jax.random.PRNGKey(0)
    kx, kw_, kb, kg, kbe = jax.random.split(key, 5)

    x = jax.random.normal(kx, (N, C, H, W), dtype=jnp.float32)
    fan_in = C * KH * KW
    bound = 1.0 / (fan_in ** 0.5)
    weight = jax.random.uniform(kw_, (OC, C, KH, KW), jnp.float32, -bound, bound)
    bias = jax.random.uniform(kb, (OC,), jnp.float32, -bound, bound)
    gamma = jax.random.uniform(kg, (OC,), jnp.float32, 0.5, 1.5)
    beta = jax.random.uniform(kbe, (OC,), jnp.float32, -0.5, 0.5)

    # tm=64, tk=128 -> 2 M tiles and 2 K tiles at this toy size: exercises both the
    # per-tile partial-statistics path and the K-axis accumulation path.
    out = conv_block_forward(x, weight, bias, gamma, beta,
                             kernel_size=4, stride=2, padding=1, tm=64, tk=128)
    jax.block_until_ready(out)

    assert out.shape == (N, OC, 8, 8), out.shape
    assert bool(jnp.all(out >= 0.0))  # ReLU output is non-negative

    ref = _reference_forward(x, weight, bias, gamma, beta, stride=2, padding=1)
    max_err = float(jnp.max(jnp.abs(out - ref)))
    assert max_err < 0.1, max_err  # bf16 MXU operands / bf16 stored y vs f32 reference

    print("KERNEL_OK")
</pallas_src>

<mosaic_0001>
module attributes {stable_mosaic.version = 11 : i64} {
  func.func @_conv_stats_kernel(%arg0: i32, %arg1: i32, %arg2: memref<64x128xbf16, #tpu.memory_space<vmem>>, %arg3: memref<128x128xbf16, #tpu.memory_space<vmem>>, %arg4: memref<64x128xbf16, #tpu.memory_space<vmem>>, %arg5: memref<1x1x128xf32, #tpu.memory_space<vmem>>, %arg6: memref<1x1x128xf32, #tpu.memory_space<vmem>>, %arg7: memref<64x128xf32, #tpu.memory_space<vmem>>) attributes {dimension_semantics = [#tpu.dimension_semantics<parallel>, #tpu.dimension_semantics<arbitrary>], iteration_bounds = array<i64: 2, 2>, scalar_prefetch = 0 : i64, scratch_operands = 1 : i64, tpu.core_type = #tpu.core_type<tc>, window_params = [{transform_indices = @transform_0, window_bounds = array<i64: 64, 128>}, {transform_indices = @transform_1, window_bounds = array<i64: 128, 128>}, {transform_indices = @transform_2, window_bounds = array<i64: 64, 128>}, {transform_indices = @transform_3, window_bounds = array<i64: 1, 1, 128>}, {transform_indices = @transform_4, window_bounds = array<i64: 1, 1, 128>}]} {
    %c0_i32 = arith.constant 0 : i32
    %0 = arith.cmpi eq, %arg1, %c0_i32 : i32
    %1 = arith.extui %0 : i1 to i32
    %c0_i32_0 = arith.constant 0 : i32
    %2 = arith.cmpi ne, %1, %c0_i32_0 : i32
    scf.if %2 {
      %cst_9 = arith.constant 0.000000e+00 : f32
      %12 = vector.broadcast %cst_9 : f32 to vector<64x128xf32>
      %c0_10 = arith.constant 0 : index
      %c0_11 = arith.constant 0 : index
      %13 = vector.load %arg7[%c0_10, %c0_11] : memref<64x128xf32, #tpu.memory_space<vmem>>, vector<64x128xf32>
      tpu.vector_store %arg7[%c0_10, %c0_11], %12 {strides = array<i32>} : memref<64x128xf32, #tpu.memory_space<vmem>>, vector<64x128xf32>,
    } else {
    }
    %c0 = arith.constant 0 : index
    %c0_1 = arith.constant 0 : index
    %3 = vector.load %arg7[%c0, %c0_1] : memref<64x128xf32, #tpu.memory_space<vmem>>, vector<64x128xf32>
    %c0_2 = arith.constant 0 : index
    %c0_3 = arith.constant 0 : index
    %4 = vector.load %arg2[%c0_2, %c0_3] : memref<64x128xbf16, #tpu.memory_space<vmem>>, vector<64x128xbf16>
    %c0_4 = arith.constant 0 : index
    %c0_5 = arith.constant 0 : index
    %5 = vector.load %arg3[%c0_4, %c0_5] : memref<128x128xbf16, #tpu.memory_space<vmem>>, vector<128x128xbf16>
    %cst = arith.constant dense<0.000000e+00> : vector<64x128xf32>
    %6 = tpu.matmul %4, %5, %cst {dimension_numbers = #tpu.dot_dimension_numbers<[1], [0], [0], [1], [0, 0, 1, 1], [], []>} : vector<64x128xbf16>, vector<128x128xbf16>, vector<64x128xf32> -> vector<64x128xf32>
    %7 = arith.addf %3, %6 : vector<64x128xf32>
    %c0_6 = arith.constant 0 : index
    %c0_7 = arith.constant 0 : index
    %8 = vector.load %arg7[%c0_6, %c0_7] : memref<64x128xf32, #tpu.memory_space<vmem>>, vector<64x128xf32>
    tpu.vector_store %arg7[%c0_6, %c0_7], %7 {strides = array<i32>} : memref<64x128xf32, #tpu.memory_space<vmem>>, vector<64x128xf32>,
    %c1_i32 = arith.constant 1 : i32
    %9 = arith.cmpi eq, %arg1, %c1_i32 : i32
    %10 = arith.extui %9 : i1 to i32
    %c0_i32_8 = arith.constant 0 : i32
    %11 = arith.cmpi ne, %10, %c0_i32_8 : i32
    scf.if %11 {
      %c0_9 = arith.constant 0 : index
      %c0_10 = arith.constant 0 : index
      %12 = vector.load %arg7[%c0_9, %c0_10] : memref<64x128xf32, #tpu.memory_space<vmem>>, vector<64x128xf32>
      %13 = arith.truncf %12 : vector<64x128xf32> to vector<64x128xbf16>
      %c0_11 = arith.constant 0 : index
      %c0_12 = arith.constant 0 : index
      %14 = vector.load %arg4[%c0_11, %c0_12] : memref<64x128xbf16, #tpu.memory_space<vmem>>, vector<64x128xbf16>
      tpu.vector_store %arg4[%c0_11, %c0_12], %13 {strides = array<i32>} : memref<64x128xbf16, #tpu.memory_space<vmem>>, vector<64x128xbf16>,
      %cst_13 = arith.constant dense<0.000000e+00> : vector<128xf32>
      %15 = vector.multi_reduction <add>, %12, %cst_13 [0] : vector<64x128xf32> to vector<128xf32>
      %16 = vector.shape_cast %15 : vector<128xf32> to vector<1x128xf32>
      %17 = vector.shape_cast %16 : vector<1x128xf32> to vector<1x1x128xf32>
      %c0_14 = arith.constant 0 : index
      %c0_15 = arith.constant 0 : index
      %c0_16 = arith.constant 0 : index
      %18 = vector.load %arg5[%c0_14, %c0_15, %c0_16] : memref<1x1x128xf32, #tpu.memory_space<vmem>>, vector<1x1x128xf32>
      tpu.vector_store %arg5[%c0_14, %c0_15, %c0_16], %17 {strides = array<i32>} : memref<1x1x128xf32, #tpu.memory_space<vmem>>, vector<1x1x128xf32>,
      %19 = arith.mulf %12, %12 : vector<64x128xf32>
      %cst_17 = arith.constant dense<0.000000e+00> : vector<128xf32>
      %20 = vector.multi_reduction <add>, %19, %cst_17 [0] : vector<64x128xf32> to vector<128xf32>
      %21 = vector.shape_cast %20 : vector<128xf32> to vector<1x128xf32>
      %22 = vector.shape_cast %21 : vector<1x128xf32> to vector<1x1x128xf32>
      %c0_18 = arith.constant 0 : index
      %c0_19 = arith.constant 0 : index
      %c0_20 = arith.constant 0 : index
      %23 = vector.load %arg6[%c0_18, %c0_19, %c0_20] : memref<1x1x128xf32, #tpu.memory_space<vmem>>, vector<1x1x128xf32>
      tpu.vector_store %arg6[%c0_18, %c0_19, %c0_20], %22 {strides = array<i32>} : memref<1x1x128xf32, #tpu.memory_space<vmem>>, vector<1x1x128xf32>,
    } else {
    }
    return
  }
  func.func @transform_0(%arg0: i32, %arg1: i32) -> (i32, i32) {
    %c0_i32 = arith.constant 0 : i32
    return %arg0, %arg1 : i32, i32
  }
  func.func @transform_1(%arg0: i32, %arg1: i32) -> (i32, i32) {
    %c0_i32 = arith.constant 0 : i32
    %c0_i32_0 = arith.constant 0 : i32
    return %arg1, %c0_i32 : i32, i32
  }
  func.func @transform_2(%arg0: i32, %arg1: i32) -> (i32, i32) {
    %c0_i32 = arith.constant 0 : i32
    %c0_i32_0 = arith.constant 0 : i32
    return %arg0, %c0_i32 : i32, i32
  }
  func.func @transform_3(%arg0: i32, %arg1: i32) -> (i32, i32, i32) {
    %c0_i32 = arith.constant 0 : i32
    %c0_i32_0 = arith.constant 0 : i32
    %c0_i32_1 = arith.constant 0 : i32
    return %arg0, %c0_i32, %c0_i32_0 : i32, i32, i32
  }
  func.func @transform_4(%arg0: i32, %arg1: i32) -> (i32, i32, i32) {
    %c0_i32 = arith.constant 0 : i32
    %c0_i32_0 = arith.constant 0 : i32
    %c0_i32_1 = arith.constant 0 : i32
    return %arg0, %c0_i32, %c0_i32_0 : i32, i32, i32
  }
}

module attributes {stable_mosaic.version = 11 : i64} {
  func.func @_bn_relu_kernel(%arg0: i32, %arg1: memref<64x128xbf16, #tpu.memory_space<vmem>>, %arg2: memref<1x128xf32, #tpu.memory_space<vmem>>, %arg3: memref<1x128xf32, #tpu.memory_space<vmem>>, %arg4: memref<64x128xbf16, #tpu.memory_space<vmem>>) attributes {dimension_semantics = [#tpu.dimension_semantics<parallel>], iteration_bounds = array<i64: 2>, scalar_prefetch = 0 : i64, scratch_operands = 0 : i64, tpu.core_type = #tpu.core_type<tc>, window_params = [{transform_indices = @transform_0, window_bounds = array<i64: 64, 128>}, {pipeline_mode = #tpu.pipeline_mode<synchronous>, transform_indices = @transform_1, window_bounds = array<i64: 1, 128>}, {pipeline_mode = #tpu.pipeline_mode<synchronous>, transform_indices = @transform_2, window_bounds = array<i64: 1, 128>}, {transform_indices = @transform_3, window_bounds = array<i64: 64, 128>}]} {
    %c0 = arith.constant 0 : index
    %c0_0 = arith.constant 0 : index
    %0 = vector.load %arg1[%c0, %c0_0] : memref<64x128xbf16, #tpu.memory_space<vmem>>, vector<64x128xbf16>
    %1 = arith.extf %0 : vector<64x128xbf16> to vector<64x128xf32>
    %c0_1 = arith.constant 0 : index
    %c0_2 = arith.constant 0 : index
    %2 = vector.load %arg2[%c0_1, %c0_2] : memref<1x128xf32, #tpu.memory_space<vmem>>, vector<1x128xf32>
    %3 = vector.broadcast %2 : vector<1x128xf32> to vector<64x128xf32>
    %4 = arith.mulf %1, %3 : vector<64x128xf32>
    %c0_3 = arith.constant 0 : index
    %c0_4 = arith.constant 0 : index
    %5 = vector.load %arg3[%c0_3, %c0_4] : memref<1x128xf32, #tpu.memory_space<vmem>>, vector<1x128xf32>
    %6 = vector.broadcast %5 : vector<1x128xf32> to vector<64x128xf32>
    %7 = arith.addf %4, %6 : vector<64x128xf32>
    %cst = arith.constant 0.000000e+00 : f32
    %8 = vector.broadcast %cst : f32 to vector<64x128xf32>
    %9 = arith.maximumf %7, %8 : vector<64x128xf32>
    %10 = arith.truncf %9 : vector<64x128xf32> to vector<64x128xbf16>
    %c0_5 = arith.constant 0 : index
    %c0_6 = arith.constant 0 : index
    %11 = vector.load %arg4[%c0_5, %c0_6] : memref<64x128xbf16, #tpu.memory_space<vmem>>, vector<64x128xbf16>
    tpu.vector_store %arg4[%c0_5, %c0_6], %10 {strides = array<i32>} : memref<64x128xbf16, #tpu.memory_space<vmem>>, vector<64x128xbf16>,
    return
  }
  func.func @transform_0(%arg0: i32) -> (i32, i32) {
    %c0_i32 = arith.constant 0 : i32
    %c0_i32_0 = arith.constant 0 : i32
    return %arg0, %c0_i32 : i32, i32
  }
  func.func @transform_1(%arg0: i32) -> (i32, i32) {
    %c0_i32 = arith.constant 0 : i32
    %c0_i32_0 = arith.constant 0 : i32
    %c0_i32_1 = arith.constant 0 : i32
    return %c0_i32, %c0_i32_0 : i32, i32
  }
  func.func @transform_2(%arg0: i32) -> (i32, i32) {
    %c0_i32 = arith.constant 0 : i32
    %c0_i32_0 = arith.constant 0 : i32
    %c0_i32_1 = arith.constant 0 : i32
    return %c0_i32, %c0_i32_0 : i32, i32
  }
  func.func @transform_3(%arg0: i32) -> (i32, i32) {
    %c0_i32 = arith.constant 0 : i32
    %c0_i32_0 = arith.constant 0 : i32
    return %arg0, %c0_i32 : i32, i32
  }
}

</mosaic_0001>

<bundles_post_ra>
// kernel: conv_block_forward.2
= control target key start
LH: loop header
LB: loop body
LE: loop exit
PB: predicated region body
PF: predicated region fallthrough
CT: control target
= control target key end

     0   :  { %s1022_s15 = smov 0   ;;  %s1024_s16 = smov 0   ;;  %s1160_s0 = inlined_call_operand.vmem [shape: bf16[128,256], index: 0, kind: input, shape index: {}]   ;;  %s1161_s1 = inlined_call_operand.vmem [shape: bf16[256,128], index: 1, kind: input, shape index: {}]   ;;  %s1162_s2 = inlined_call_operand.vmem [shape: bf16[128,128], index: 2, kind: output, shape index: {0}]   ;;  %s1163_s3 = inlined_call_operand.vmem [shape: f32[2,1,128], index: 3, kind: output, shape index: {1}]   ;;  %s1164_s4 = inlined_call_operand.vmem [shape: f32[2,1,128], index: 4, kind: output, shape index: {2}]  }
   0x1   :  { %s1026_s17 = smov 0   ;;  %s1028_s18 = smov 0  }
   0x2   :  { %s1030_s19 = smov 0   ;;  %s1032_s20 = smov 0  }
   0x3   :  { %s1034_s21 = smov 0  }
   0x4 LB: > { %s24_s22 = sadd.s32 1, %s986_s19  ;;  %s27_s23 = sadd.s32 1, %s990_s20  ;;  %s994_s21 = sphi %s1034_s21, %s15_s21   ;;  %s990_s20 = sphi %s1032_s20, %s1170_s20   ;;  %s986_s19 = sphi %s1030_s19, %s1169_s19   ;;  %s982_s18 = sphi %s1028_s18, %s1168_s18   ;;  %s978_s17 = sphi %s1026_s17, %s1167_s17   ;;  %s974_s16 = sphi %s1024_s16, %s1166_s16   ;;  %s970_s15 = sphi %s1022_s15, %s1165_s15  }
   0x5   : > { %p25_p0 = scmp.ge.s32.totalorder %s24_s22, 2  ;;  %p43_p1 = scmp.ne.s32.totalorder %s974_s16, %s970_s15 }
   0x6   : > { %p44_p2 = scmp.eq.s32.totalorder %s994_s21, 0  ;;  %s36_s27 = sadd.s32 1, %s974_s16 }
   0x7   : > { %s1172_s22 = smov (%p25_p0, %s24_s22), 0  ;;  %s1174_s23 = smov (!%p25_p0, %s27_s23), %s990_s20 }
   0x8   : > { %p45_p3 = por %p44_p2, %p43_p1  ;;  %p29_p4 = scmp.ge.s32.totalorder %s1174_s23, 2 }
   0x9   : > { %s32_s24 = ssub.s32 %s986_s19, %s1172_s22  ;;  %p752_p6 = scmp.ge.s32.totalorder %s994_s21, 4 }
   0xa   : > { %s1176_s23 = smov (%p29_p4, %s1174_s23), 0 }
   0xb   : > { %s31_s25 = ssub.s32 %s990_s20, %s1176_s23  ;;  %173 = sbr.rel (%p752_p6) target bundleno = 29 (0x1d), region = 16 }
   0xc   : > { %s33_s26 = sor.u32 %s32_s24, %s31_s25 }
   0xd   : > { %p34_p5 = scmp.eq.s32.totalorder %s33_s26, 0 }
   0xf   : > { %s1073_s28 = scalar_select %p34_p5, %s974_s16, %s36_s27  }
  0x12   : > { %176 = sbr.rel (!%p45_p3) target bundleno = 29 (0x1d), region = 20  ;;  %s178_s29 = sand.u32 (%p45_p3), 1, %s974_s16  }
  0x13   : > { %s787_s30 = sshll.u32 (%p45_p3), %s990_s20, 4  ;;  %s753_s5 = sshll.u32 (%p45_p3), %s178_s29, 5 }
  0x14   : > { %s183_s6 = sadd.s32 (%p45_p3), %s986_s19, %s787_s30  ;;  %s180_s11 = scalar_lea.vmem (%p45_p3), [#allocation3], %s753_s5 }
  0x15   : > { %s756_s7 = sshll.u32 (%p45_p3), %s183_s6, 2 }
  0x16   : > { %s185_s10 = scalar_lea.vmem (%p45_p3), %s1160_s0, %s756_s7 }
  0x17   : > { %v201_v0 = vld [vmem:[%s185_s10] sm:$0xf] (%p45_p3)  ;;  %v203_v1 = vld [vmem:[%s185_s10 + $0x8] sm:$0xf] (%p45_p3)  ;;  %v205_v2 = vld [vmem:[%s185_s10 + $0x10] sm:$0xf] (%p45_p3) }
  0x18   : > { %202 = vst [vmem:[%s180_s11] sm:$0xf] (%p45_p3), %v201_v0  ;;  %204 = vst [vmem:[%s180_s11 + $0x4] sm:$0xf] (%p45_p3), %v203_v1  ;;  %v207_v3 = vld [vmem:[%s185_s10 + $0x18] sm:$0xf] (%p45_p3) }
  0x19   : > { %206 = vst [vmem:[%s180_s11 + $0x8] sm:$0xf] %v205_v2  ;;  %v209_v4 = vld [vmem:[%s185_s10 + $0x20] sm:$0xf]  ;;  %v211_v5 = vld [vmem:[%s185_s10 + $0x28] sm:$0xf] }
  0x1a   : > { %208 = vst [vmem:[%s180_s11 + $0xc] sm:$0xf] %v207_v3  ;;  %210 = vst [vmem:[%s180_s11 + $0x10] sm:$0xf] %v209_v4  ;;  %v213_v6 = vld [vmem:[%s185_s10 + $0x30] sm:$0xf] }
  0x1b   : > { %212 = vst [vmem:[%s180_s11 + $0x14] sm:$0xf] %v211_v5  ;;  %v215_v7 = vld [vmem:[%s185_s10 + $0x38] sm:$0xf]  ;;  %214 = vst [vmem:[%s180_s11 + $0x18] sm:$0xf] %v213_v6 }
  0x1c   : > { %216 = vst [vmem:[%s180_s11 + $0x1c] sm:$0xf] %v215_v7 }
  0x1d PF: > { %p757_p7 = scmp.ge.s32.totalorder %s994_s21, 1  ;;  %p263_p8 = scmp.lt.s32.totalorder %s994_s21, 5 }
  0x1f   : > { %p264_p9 = pnand %p757_p7, %p263_p8 }
  0x20   : > { %s270_s12 = sand.u32 (!%p264_p9), 1, %s970_s15   ;;  %s759_s13 = sshll.u32 (!%p264_p9), %s978_s17, 4 }
  0x21   : > { %267 = sbr.rel (%p264_p9) target bundleno = 339 (0x153), region = 65  ;;  %s758_s14 = sshll.u32 (!%p264_p9), %s270_s12, 5 }
  0x22   : > { %p308_p10 = scmp.lt.s32.totalorder (!%p264_p9), %s759_s13, 31  ;;  %s761_s24 = sshll.u32 (!%p264_p9), %s982_s18, 3 }
  0x23   : > { %p314_p11 = scmp.lt.s32.totalorder (!%p264_p9), %s761_s24, 15  ;;  %p319_p12 = scmp.lt.s32.totalorder (!%p264_p9), %s982_s18, 1 }
  0x24   : > { %p763_p13 = scmp.ne.s32.totalorder (!%p264_p9), %s978_s17, 0 }
  0x28   : > { %s1178_s13 = smov (!%p308_p10, %s759_s13), 31  ;;  %s1180_s24 = smov (!%p314_p11, %s761_s24), 15 }
  0x29   : > { %s760_s25 = sshll.u32 %s1178_s13, 2  ;;  %s1182_s18 = smov (!%p319_p12, %s982_s18), 1  ;;  %v996_v8 = vmov (!%p763_p13), 0.0  }
  0x2a   : > { %s1091_s29 = scalar_lea.vmem %s1161_s1, %s760_s25  ;;  %s762_s30 = sshll.u32 %s1180_s24, 2  ;;  %330 = vst [vmem:[#allocation2] sm:$0xff] (!%p763_p13), %v996_v8  ;;  %331 = vst [vmem:[#allocation2 + $0x8] sm:$0xff] (!%p763_p13), %v996_v8 }
  0x2b   : > { %s1099_s6 = scalar_lea.vmem %s1162_s2, %s762_s30  ;;  %s321_s9 = scalar_lea.vmem %s1163_s3, %s1182_s18  ;;  %332 = vst [vmem:[#allocation2 + $0x10] sm:$0xff] (!%p763_p13), %v996_v8  ;;  %333 = vst [vmem:[#allocation2 + $0x18] sm:$0xff] (!%p763_p13), %v996_v8 }
  0x2c   : > { %s324_s12 = scalar_lea.vmem %s1164_s4, %s1182_s18  ;;  %s1109_s13 = scalar_lea.vmem [#allocation3], %s758_s14  ;;  %334 = vst [vmem:[#allocation2 + $0x20] sm:$0xff] (!%p763_p13), %v996_v8  ;;  %335 = vst [vmem:[#allocation2 + $0x28] sm:$0xff] (!%p763_p13), %v996_v8 }
  0x2d   : > { %329 = sbr.rel (%p763_p13) target bundleno = 52 (0x34), region = 73  ;;  %336 = vst [vmem:[#allocation2 + $0x30] sm:$0xff] (!%p763_p13), %v996_v8  ;;  %337 = vst [vmem:[#allocation2 + $0x38] sm:$0xff] (!%p763_p13), %v996_v8 }
  0x34 PF: > { %v928_v9 = vld [vmem:[%s1091_s29] sm:$0xff]   ;;  %v929_v10 = vld [vmem:[%s1091_s29 + $0x8] sm:$0xff]   ;;  %v930_v11 = vld [vmem:[%s1091_s29 + $0x10] sm:$0xff]   ;;  %p776_p0 = scmp.ne.s32.totalorder %s978_s17, 1 }
  0x35   : > { %831 = vmatprep.subr.bf16.mxu0 %v928_v9  ;;  %855 = vmatprep.subr.bf16.mxu1 %v928_v9  ;;  %v931_v12 = vld [vmem:[%s1091_s29 + $0x18] sm:$0xff]   ;;  %v936_v13 = vld [vmem:[%s1109_s13] sm:$0xff]   ;;  %v937_v14 = vld [vmem:[%s1109_s13 + $0x10] sm:$0xff]  }
  0x36   : > { %832 = vmatpush3.bf16.msra.mxu0 %v928_v9  ;;  %863 = vmatpush3.bf16.msra.mxu1 %v928_v9  ;;  %v932_v15 = vld [vmem:[%s1091_s29 + $0x20] sm:$0xff]   ;;  %v933_v16 = vld [vmem:[%s1091_s29 + $0x28] sm:$0xff]   ;;  %v934_v17 = vld [vmem:[%s1091_s29 + $0x30] sm:$0xff]  }
  0x37   : > { %833 = vmatprep.subr.bf16.mxu0 %v929_v10  ;;  %856 = vmatprep.subr.bf16.mxu1 %v929_v10  ;;  %v935_v18 = vld [vmem:[%s1091_s29 + $0x38] sm:$0xff]   ;;  %v938_v19 = vld [vmem:[%s1109_s13 + $0x8] sm:$0xff]   ;;  %v340_v21 = vld [vmem:[#allocation2 + $0x10] sm:$0xff] }
  0x38   : > { %847 = vmatprep.mubr.bf16.mxu0 %v936_v13  ;;  %851 = vmatprep.mubr.bf16.mxu1 %v937_v14  ;;  %v939_v20 = vld [vmem:[%s1109_s13 + $0x18] sm:$0xff]   ;;  %v344_v22 = vld [vmem:[#allocation2 + $0x30] sm:$0xff]  ;;  %v338_v23 = vld [vmem:[#allocation2] sm:$0xff] }
  0x39   : > { %v342_v24 = vld [vmem:[#allocation2 + $0x20] sm:$0xff]  ;;  %v341_v27 = vld [vmem:[#allocation2 + $0x18] sm:$0xff]  ;;  %v339_v33 = vld [vmem:[#allocation2 + $0x8] sm:$0xff] }
  0x3a   : > { %834 = vmatpush3.bf16.msra.mxu0 %v929_v10  ;;  %864 = vmatpush3.bf16.msra.mxu1 %v929_v10  ;;  %v345_v28 = vld [vmem:[#allocation2 + $0x38] sm:$0xff]  ;;  %v343_v34 = vld [vmem:[#allocation2 + $0x28] sm:$0xff] }
  0x3b   : > { %835 = vmatprep.subr.bf16.mxu0 %v930_v11  ;;  %857 = vmatprep.subr.bf16.mxu1 %v930_v11 }
  0x3e   : > { %836 = vmatpush3.bf16.msra.mxu0 %v930_v11  ;;  %865 = vmatpush3.bf16.msra.mxu1 %v930_v11 }
  0x3f   : > { %837 = vmatprep.subr.bf16.mxu0 %v931_v12  ;;  %858 = vmatprep.subr.bf16.mxu1 %v931_v12 }
  0x42   : > { %838 = vmatpush3.bf16.msra.mxu0 %v931_v12  ;;  %866 = vmatpush3.bf16.msra.mxu1 %v931_v12 }
  0x43   : > { %839 = vmatprep.subr.bf16.mxu0 %v932_v15  ;;  %859 = vmatprep.subr.bf16.mxu1 %v932_v15 }
  0x46   : > { %840 = vmatpush3.bf16.msra.mxu0 %v932_v15  ;;  %867 = vmatpush3.bf16.msra.mxu1 %v932_v15 }
  0x47   : > { %841 = vmatprep.subr.bf16.mxu0 %v933_v16  ;;  %860 = vmatprep.subr.bf16.mxu1 %v933_v16 }
  0x4a   : > { %842 = vmatpush3.bf16.msra.mxu0 %v933_v16  ;;  %868 = vmatpush3.bf16.msra.mxu1 %v933_v16 }
  0x4b   : > { %843 = vmatprep.subr.bf16.mxu0 %v934_v17  ;;  %861 = vmatprep.subr.bf16.mxu1 %v934_v17 }
  0x4e   : > { %844 = vmatpush3.bf16.msra.mxu0 %v934_v17  ;;  %869 = vmatpush3.bf16.msra.mxu1 %v934_v17 }
  0x4f   : > { %845 = vmatprep.subr.bf16.mxu0 %v935_v18  ;;  %862 = vmatprep.subr.bf16.mxu1 %v935_v18 }
  0x52   : > { %846 = vmatpush3.bf16.msra.mxu0 %v935_v18  ;;  %870 = vmatpush3.bf16.msra.mxu1 %v935_v18 }
  0x55   : > { %848 = vmatmul.mubr.bf16.vlgmr.msra.gmra.mrb[0].mxu0 %v938_v19  ;;  %852 = vmatmul.mubr.bf16.vlgmr.msra.gmra.mrb[0].mxu1 %v939_v20 }
 0x128   : > { %v849_v25 = vpop.f32.mrb[0].mxu0  ;;  %v853_v26 = vpop.f32.mrb[0].mxu1  ;;  %526 = sbr.rel (%p776_p0) target bundleno = 339 (0x153), region = 77 }
 0x129   : > { %v509_v29 = vadd.f32 %v849_v25, %v340_v21  ;;  %v513_v30 = vadd.f32 %v853_v26, %v344_v22  ;;  %v476_v31 = vpop.f32.mrb[1].mxu0  ;;  %v492_v32 = vpop.f32.mrb[1].mxu1 }
 0x12a   : > { %v507_v35 = vadd.f32 %v476_v31, %v338_v23  ;;  %v511_v36 = vadd.f32 %v492_v32, %v342_v24  ;;  %v850_v37 = vpop.f32.mrb[2].mxu0  ;;  %v854_v38 = vpop.f32.mrb[2].mxu1 }
 0x12b   : > { %517 = vst [vmem:[#allocation2 + $0x10] sm:$0xff] %v509_v29  ;;  %521 = vst [vmem:[#allocation2 + $0x30] sm:$0xff] %v513_v30  ;;  %v510_v39 = vadd.f32 %v850_v37, %v341_v27  ;;  %v514_v40 = vadd.f32 %v854_v38, %v345_v28  ;;  %v479_v41 = vpop.f32.mrb[3].mxu0  ;;  %v495_v42 = vpop.f32.mrb[3].mxu1 }
 0x12c   : > { %515 = vst [vmem:[#allocation2] sm:$0xff] %v507_v35  ;;  %519 = vst [vmem:[#allocation2 + $0x20] sm:$0xff] %v511_v36  ;;  %v508_v43 = vadd.f32 %v479_v41, %v339_v33  ;;  %v512_v44 = vadd.f32 %v495_v42, %v343_v34 }
 0x12d   : > { %518 = vst [vmem:[#allocation2 + $0x18] sm:$0xff] %v510_v39  ;;  %522 = vst [vmem:[#allocation2 + $0x38] sm:$0xff] %v514_v40 }
 0x12e   : > { %516 = vst [vmem:[#allocation2 + $0x8] sm:$0xff] %v508_v43  ;;  %520 = vst [vmem:[#allocation2 + $0x28] sm:$0xff] %v512_v44 }
 0x132   : > { %v529_v47 = vld [vmem:[#allocation2 + $0x10] sm:$0xff] }
 0x133   : > { %v527_v45 = vld [vmem:[#allocation2] sm:$0xff]  ;;  %v591_v56 = vmul.f32 %v529_v47, %v529_v47  ;;  %v533_v61 = vld [vmem:[#allocation2 + $0x30] sm:$0xff] }
 0x134   : > { %v589_v50 = vmul.f32 %v527_v45, %v527_v45  ;;  %v530_v52 = vld [vmem:[#allocation2 + $0x18] sm:$0xff]  ;;  %v531_v53 = vld [vmem:[#allocation2 + $0x20] sm:$0xff]  ;;  %v595_v8 = vmul.f32 %v533_v61, %v533_v61 }
 0x135   : > { %v528_v46 = vld [vmem:[#allocation2 + $0x8] sm:$0xff]  ;;  %v804_v55 = vpack.c.bf16 %v530_v52, %v529_v47  ;;  %v592_v60 = vmul.f32 %v530_v52, %v530_v52  ;;  %v534_v62 = vld [vmem:[#allocation2 + $0x38] sm:$0xff]  ;;  %v593_v2 = vmul.f32 %v531_v53, %v531_v53 }
 0x136   : > { %v799_v48 = vpack.c.bf16 %v528_v46, %v527_v45  ;;  %v575_v49 = vadd.f32 %v528_v46, %v527_v45  ;;  %v590_v51 = vmul.f32 %v528_v46, %v528_v46  ;;  %v532_v54 = vld [vmem:[#allocation2 + $0x28] sm:$0xff]  ;;  %v814_v63 = vpack.c.bf16 %v534_v62, %v533_v61 }
 0x137   : > { %v809_v57 = vpack.c.bf16 %v532_v54, %v531_v53  ;;  %816 = vst [vmem:[%s1099_s6 + $0x8] sm:$0xff] %v804_v55   ;;  %v594_v5 = vmul.f32 %v532_v54, %v532_v54  ;;  %v596_v11 = vmul.f32 %v534_v62, %v534_v62 }
 0x138   : > { %800 = vst [vmem:[%s1099_s6] sm:$0xff] %v799_v48   ;;  %v597_v58 = vadd.f32 %v590_v51, %v589_v50  ;;  %v576_v59 = vadd.f32 %v575_v49, %v529_v47  ;;  %818 = vst [vmem:[%s1099_s6 + $0x18] sm:$0xff] %v814_v63  }
 0x139   : > { %817 = vst [vmem:[%s1099_s6 + $0x10] sm:$0xff] %v809_v57  }
 0x13a   : > { %v577_v0 = vadd.f32 %v576_v59, %v530_v52  ;;  %v598_v1 = vadd.f32 %v597_v58, %v591_v56 }
 0x13c   : > { %v599_v3 = vadd.f32 %v598_v1, %v592_v60  ;;  %v578_v4 = vadd.f32 %v577_v0, %v531_v53 }
 0x13e   : > { %v579_v6 = vadd.f32 %v578_v4, %v532_v54  ;;  %v600_v7 = vadd.f32 %v599_v3, %v593_v2 }
 0x140   : > { %v601_v9 = vadd.f32 %v600_v7, %v594_v5  ;;  %v580_v10 = vadd.f32 %v579_v6, %v533_v61 }
 0x142   : > { %v581_v12 = vadd.f32 %v580_v10, %v534_v62  ;;  %v602_v13 = vadd.f32 %v601_v9, %v595_v8 }
 0x144   : > { %v582_v14 = vrot.slane %v581_v12, 4  ;;  %v603_v15 = vadd.f32 %v602_v13, %v596_v11 }
 0x146   : > { %v583_v16 = vadd.f32 %v582_v14, %v581_v12  ;;  %v604_v17 = vrot.slane %v603_v15, 4 }
 0x148   : > { %v584_v18 = vrot.slane %v583_v16, 2  ;;  %v605_v19 = vadd.f32 %v604_v17, %v603_v15 }
 0x14a   : > { %v585_v20 = vadd.f32 %v584_v18, %v583_v16  ;;  %v606_v21 = vrot.slane %v605_v19, 2 }
 0x14c   : > { %v586_v22 = vrot.slane %v585_v20, 1  ;;  %v607_v23 = vadd.f32 %v606_v21, %v605_v19 }
 0x14e   : > { %v587_v24 = vadd.f32 %v586_v22, %v585_v20  ;;  %v608_v25 = vrot.slane %v607_v23, 1 }
 0x150   : > { %588 = vst [vmem:[%s321_s9] sm:$0x1] %v587_v24  ;;  %v609_v26 = vadd.f32 %v608_v25, %v607_v23 }
 0x152   : > { %610 = vst [vmem:[%s324_s12] sm:$0x1] %v609_v26 }
 0x153 PF: > { %s15_s21 = sadd.s32 1, %s994_s21   ;;  %s1165_s15 = smov %s974_s16 }
 0x154   : > { %p12_p1 = scmp.ge.s32.totalorder %s15_s21, 6   ;;  %s1166_s16 = smov %s1073_s28 }
 0x155   : > { %s1167_s17 = smov %s986_s19  ;;  %s1168_s18 = smov %s990_s20 }
 0x156   : > { %s1169_s19 = smov %s1172_s22  ;;  %s1170_s20 = smov %s1176_s23 }
 0x157   :  { %14 = sbr.rel (!%p12_p1) target bundleno = 4 (0x4), region = 139 }

// kernel: conv_block_forward.3
= control target key start
LH: loop header
LB: loop body
LE: loop exit
PB: predicated region body
PF: predicated region fallthrough
CT: control target
= control target key end

     0   :  { %s431_s12 = smov 0   ;;  %s461_s0 = inlined_call_operand.vmem [shape: bf16[128,128], index: 0, kind: input, shape index: {}, may-alias: {0,3}]   ;;  %s462_s1 = inlined_call_operand.vmem [shape: f32[1,128], index: 1, kind: input, shape index: {}]   ;;  %s463_s2 = inlined_call_operand.vmem [shape: f32[1,128], index: 2, kind: input, shape index: {}]   ;;  %s464_s3 = inlined_call_operand.vmem [shape: bf16[128,128], index: 3, kind: output, shape index: {}, may-alias: {0,3}]  }
   0x1 LB: > { %s324_s13 = sadd.s32 4294967295, %s409_s12   ;;  %p328_p0 = scmp.ge.s32.totalorder %s409_s12, 1  ;;  %s409_s12 = sphi %s431_s12, %s13_s12  }
   0x2   : > { %p138_p1 = scmp.lt.s32.totalorder %s409_s12, 3 }
   0x4   : > { %p139_p2 = pnand %p328_p0, %p138_p1 }
   0x5   : > { %s329_s14 = sshll.u32 (!%p139_p2), %s324_s13, 3  ;;  %v333_v0 = vld [vmem:[%s462_s1] ss:$0 sm:$0xff] (!%p139_p2) }
   0x6   : > { %142 = sbr.rel (%p139_p2) target bundleno = 29 (0x1d), region = 32  ;;  %p163_p3 = scmp.lt.s32.totalorder (!%p139_p2), %s329_s14, 15  ;;  %v334_v13 = vld [vmem:[%s463_s2] ss:$0 sm:$0xff] (!%p139_p2) }
   0xd   : > { %s466_s14 = smov (!%p163_p3, %s329_s14), 15 }
   0xe   : > { %s330_s15 = sshll.u32 %s466_s14, 2 }
   0xf   : > { %s166_s18 = scalar_lea.vmem %s461_s0, %s330_s15  ;;  %s172_s25 = scalar_lea.vmem %s464_s3, %s330_s15 }
  0x10   : > { %v354_v1 = vld [vmem:[%s166_s18] sm:$0xff]   ;;  %v389_v2 = vld [vmem:[%s166_s18 + $0x8] sm:$0xff]   ;;  %v390_v3 = vld [vmem:[%s166_s18 + $0x10] sm:$0xff]  }
  0x11   : > { %v355_v4 = vunpack.c.l.bf16 %v354_v1  ;;  %v356_v5 = vunpack.c.h.bf16 %v354_v1  ;;  %v359_v6 = vunpack.c.l.bf16 %v389_v2  ;;  %v360_v7 = vunpack.c.h.bf16 %v389_v2  ;;  %v391_v8 = vld [vmem:[%s166_s18 + $0x18] sm:$0xff]  }
  0x12   : > { %v363_v9 = vunpack.c.l.bf16 %v390_v3  ;;  %v364_v10 = vunpack.c.h.bf16 %v390_v3  ;;  %v367_v11 = vunpack.c.l.bf16 %v391_v8  ;;  %v368_v12 = vunpack.c.h.bf16 %v391_v8 }
  0x13   : > { %v197_v14 = vmul.f32 %v355_v4, %v333_v0  ;;  %v198_v15 = vmul.f32 %v356_v5, %v333_v0  ;;  %v199_v16 = vmul.f32 %v359_v6, %v333_v0  ;;  %v200_v17 = vmul.f32 %v360_v7, %v333_v0 }
  0x14   : > { %v201_v18 = vmul.f32 %v363_v9, %v333_v0  ;;  %v202_v19 = vmul.f32 %v364_v10, %v333_v0  ;;  %v203_v20 = vmul.f32 %v367_v11, %v333_v0  ;;  %v204_v21 = vmul.f32 %v368_v12, %v333_v0 }
  0x15   : > { %v212_v22 = vadd.f32 %v334_v13, %v197_v14  ;;  %v213_v23 = vadd.f32 %v334_v13, %v198_v15  ;;  %v214_v24 = vadd.f32 %v334_v13, %v199_v16  ;;  %v215_v25 = vadd.f32 %v334_v13, %v200_v17 }
  0x16   : > { %v216_v26 = vadd.f32 %v334_v13, %v201_v18  ;;  %v217_v27 = vadd.f32 %v334_v13, %v202_v19  ;;  %v218_v28 = vadd.f32 %v334_v13, %v203_v20  ;;  %v219_v29 = vadd.f32 %v334_v13, %v204_v21 }
  0x17   : > { %v220_v30 = vmax.f32 %v212_v22, 0.0  ;;  %v221_v31 = vmax.f32 %v213_v23, 0.0  ;;  %v222_v32 = vmax.f32 %v214_v24, 0.0  ;;  %v223_v33 = vmax.f32 %v215_v25, 0.0 }
  0x18   : > { %v224_v34 = vmax.f32 %v216_v26, 0.0  ;;  %v225_v35 = vmax.f32 %v217_v27, 0.0  ;;  %v226_v36 = vmax.f32 %v218_v28, 0.0  ;;  %v227_v37 = vmax.f32 %v219_v29, 0.0 }
  0x19   : > { %v372_v38 = vpack.c.bf16 %v221_v31, %v220_v30  ;;  %v377_v39 = vpack.c.bf16 %v223_v33, %v222_v32 }
  0x1a   : > { %v382_v40 = vpack.c.bf16 %v225_v35, %v224_v34  ;;  %v387_v41 = vpack.c.bf16 %v227_v37, %v226_v36 }
  0x1b   : > { %373 = vst [vmem:[%s172_s25] sm:$0xff] %v372_v38   ;;  %392 = vst [vmem:[%s172_s25 + $0x8] sm:$0xff] %v377_v39  }
  0x1c   : > { %393 = vst [vmem:[%s172_s25 + $0x10] sm:$0xff] %v382_v40   ;;  %394 = vst [vmem:[%s172_s25 + $0x18] sm:$0xff] %v387_v41  }
  0x1d PF: > { %s13_s12 = sadd.s32 1, %s409_s12  }
  0x1e   : > { %p10_p4 = scmp.ge.s32.totalorder %s13_s12, 4  }
  0x20   :  { %12 = sbr.rel (!%p10_p4) target bundleno = 1 (0x1), region = 62 }

</bundles_post_ra>
